<compile_context>
chip_gen: v6e
topology: v6e:2x2x1
jax: 0.10.0
libtpu: 0.0.40
codegen_flags: <defaults>
</compile_context>

<pallas_src>
import jax
import jax.numpy as jnp
from jax.experimental import pallas as pl
from jax.experimental.pallas import tpu as pltpu


def _toy_model_kernel(f_ref, w1_ref, b1_ref, w2_ref, b2_ref, o_ref):
    # f_ref : (TB, 2)   batch tile of stacked features
    # w1_ref: (2, H)    hidden1.weight.T
    # b1_ref: (1, H)    hidden1.bias
    # w2_ref: (H, O)    hidden2.weight.T
    # b2_ref: (1, O)    hidden2.bias
    # o_ref : (TB, O)   softmax probabilities
    f = f_ref[...].astype(jnp.float32)                       # (TB, 2)
    w1 = w1_ref[...].astype(jnp.float32)                     # (2, H)

    # Layer 1: K == 2 -> pure VPU broadcast multiply-add.
    hid = (f[:, 0:1] * w1[0:1, :]
           + f[:, 1:2] * w1[1:2, :]
           + b1_ref[...].astype(jnp.float32))                # (TB, H)

    # Layer 2: MXU matmul with f32 accumulation.
    logits = jnp.dot(hid, w2_ref[...].astype(jnp.float32),
                     preferred_element_type=jnp.float32)
    logits = logits + b2_ref[...].astype(jnp.float32)        # (TB, O)

    # Numerically-stable softmax over the last (lane) axis.
    m = jnp.max(logits, axis=-1, keepdims=True)
    e = jnp.exp(logits - m)
    denom = jnp.sum(e, axis=-1, keepdims=True)
    o_ref[...] = (e / denom).astype(o_ref.dtype)


def toy_model_forward(feature1, feature2, w1, b1, w2, b2, *, block_b=512):
    """Pallas equivalent of ToyModel.forward.

    feature1, feature2 : (B,) or (B, 1)   (squeezed like the torch module)
    w1 : (H, 2),  b1 : (H,)   -- hidden1 = nn.Linear(2, H)
    w2 : (O, H),  b2 : (O,)   -- hidden2 = nn.Linear(H, O)
    Returns (B, O) softmax probabilities.
    """
    f1 = jnp.reshape(feature1, (-1,))
    f2 = jnp.reshape(feature2, (-1,))
    features = jnp.stack([f1, f2], axis=1)                   # (B, 2)

    b = features.shape[0]
    h = w1.shape[0]
    o = w2.shape[0]

    w1t = jnp.transpose(w1)                                  # (2, H)
    w2t = jnp.transpose(w2)                                  # (H, O)
    b1r = jnp.reshape(b1, (1, h))
    b2r = jnp.reshape(b2, (1, o))

    out_dtype = features.dtype

    # Batch tiling: one block for small B; sublane-aligned 512-row tiles otherwise.
    if b <= block_b:
        tb, b_padded = b, b
        feats = features
    else:
        tb = block_b                                         # multiple of 8
        b_padded = pl.cdiv(b, tb) * tb
        feats = jnp.pad(features, ((0, b_padded - b), (0, 0)))

    out = pl.pallas_call(
        _toy_model_kernel,
        out_shape=jax.ShapeDtypeStruct((b_padded, o), out_dtype),
        grid_spec=pltpu.PrefetchScalarGridSpec(
            num_scalar_prefetch=0,
            grid=(b_padded // tb,),
            in_specs=[
                pl.BlockSpec((tb, 2), lambda i: (i, 0)),     # features tile
                pl.BlockSpec((2, h), lambda i: (0, 0)),      # W1^T (broadcast)
                pl.BlockSpec((1, h), lambda i: (0, 0)),      # b1
                pl.BlockSpec((h, o), lambda i: (0, 0)),      # W2^T (broadcast)
                pl.BlockSpec((1, o), lambda i: (0, 0)),      # b2
            ],
            out_specs=pl.BlockSpec((tb, o), lambda i: (i, 0)),
        ),
        compiler_params=pltpu.CompilerParams(
            dimension_semantics=("parallel",),
            # Per-block usage is only a few KB; 32 MiB is safely within the
            # physical VMEM of v5e/v6e (128 MiB) and v7x (64 MiB).
            vmem_limit_bytes=32 * 1024 * 1024,
        ),
    )(feats, w1t, b1r, w2t, b2r)

    return out[:b]


if __name__ == "__main__":
    key = jax.random.PRNGKey(0)
    k1, k2, k3, k4, k5, k6 = jax.random.split(key, 6)

    batch, hidden, out_features = 8, 32, 10

    # Inputs shaped like the torch module expects (squeezed inside forward).
    feature1 = jax.random.normal(k1, (batch, 1), dtype=jnp.float32)
    feature2 = jax.random.normal(k2, (batch, 1), dtype=jnp.float32)

    # Parameters: hidden1 = Linear(2, hidden), hidden2 = Linear(hidden, 10).
    w1 = jax.random.normal(k3, (hidden, 2), dtype=jnp.float32) * 0.5
    b1 = jax.random.normal(k4, (hidden,), dtype=jnp.float32) * 0.1
    w2 = jax.random.normal(k5, (out_features, hidden), dtype=jnp.float32) * 0.5
    b2 = jax.random.normal(k6, (out_features,), dtype=jnp.float32) * 0.1

    out = toy_model_forward(feature1, feature2, w1, b1, w2, b2)
    out = jax.block_until_ready(out)

    # Pure-JAX reference mirroring the torch forward.
    feats_ref = jnp.stack([feature1.squeeze(), feature2.squeeze()], axis=1)
    hid_ref = feats_ref @ w1.T + b1
    logits_ref = hid_ref @ w2.T + b2
    ref = jax.nn.softmax(logits_ref, axis=-1)

    assert out.shape == (batch, out_features)
    assert jnp.allclose(out, ref, atol=1e-5, rtol=1e-5)
    assert jnp.allclose(jnp.sum(out, axis=-1), 1.0, atol=1e-5)

    print("KERNEL_OK")
</pallas_src>

<mosaic_0001>
module attributes {stable_mosaic.version = 11 : i64} {
  func.func @_toy_model_kernel(%arg0: i32, %arg1: memref<8x2xf32, #tpu.memory_space<vmem>>, %arg2: memref<2x32xf32, #tpu.memory_space<vmem>>, %arg3: memref<1x32xf32, #tpu.memory_space<vmem>>, %arg4: memref<32x10xf32, #tpu.memory_space<vmem>>, %arg5: memref<1x10xf32, #tpu.memory_space<vmem>>, %arg6: memref<8x10xf32, #tpu.memory_space<vmem>>) attributes {dimension_semantics = [#tpu.dimension_semantics<parallel>], iteration_bounds = array<i64: 1>, scalar_prefetch = 0 : i64, scratch_operands = 0 : i64, tpu.core_type = #tpu.core_type<tc>, window_params = [{transform_indices = @transform_0, window_bounds = array<i64: 8, 2>}, {pipeline_mode = #tpu.pipeline_mode<synchronous>, transform_indices = @transform_1, window_bounds = array<i64: 2, 32>}, {pipeline_mode = #tpu.pipeline_mode<synchronous>, transform_indices = @transform_2, window_bounds = array<i64: 1, 32>}, {pipeline_mode = #tpu.pipeline_mode<synchronous>, transform_indices = @transform_3, window_bounds = array<i64: 32, 10>}, {pipeline_mode = #tpu.pipeline_mode<synchronous>, transform_indices = @transform_4, window_bounds = array<i64: 1, 10>}, {transform_indices = @transform_5, window_bounds = array<i64: 8, 10>}]} {
    %c0 = arith.constant 0 : index
    %c0_0 = arith.constant 0 : index
    %0 = vector.load %arg1[%c0, %c0_0] : memref<8x2xf32, #tpu.memory_space<vmem>>, vector<8x2xf32>
    %c0_1 = arith.constant 0 : index
    %c0_2 = arith.constant 0 : index
    %1 = vector.load %arg2[%c0_1, %c0_2] : memref<2x32xf32, #tpu.memory_space<vmem>>, vector<2x32xf32>
    %2 = vector.extract_strided_slice %0 {offsets = [0, 0], sizes = [8, 1], strides = [1, 1]} : vector<8x2xf32> to vector<8x1xf32>
    %3 = vector.extract_strided_slice %1 {offsets = [0, 0], sizes = [1, 32], strides = [1, 1]} : vector<2x32xf32> to vector<1x32xf32>
    %4 = vector.broadcast %2 : vector<8x1xf32> to vector<8x32xf32>
    %5 = vector.broadcast %3 : vector<1x32xf32> to vector<8x32xf32>
    %6 = arith.mulf %4, %5 : vector<8x32xf32>
    %7 = vector.extract_strided_slice %0 {offsets = [0, 1], sizes = [8, 1], strides = [1, 1]} : vector<8x2xf32> to vector<8x1xf32>
    %8 = vector.extract_strided_slice %1 {offsets = [1, 0], sizes = [1, 32], strides = [1, 1]} : vector<2x32xf32> to vector<1x32xf32>
    %9 = vector.broadcast %7 : vector<8x1xf32> to vector<8x32xf32>
    %10 = vector.broadcast %8 : vector<1x32xf32> to vector<8x32xf32>
    %11 = arith.mulf %9, %10 : vector<8x32xf32>
    %12 = arith.addf %6, %11 : vector<8x32xf32>
    %c0_3 = arith.constant 0 : index
    %c0_4 = arith.constant 0 : index
    %13 = vector.load %arg3[%c0_3, %c0_4] : memref<1x32xf32, #tpu.memory_space<vmem>>, vector<1x32xf32>
    %14 = vector.broadcast %13 : vector<1x32xf32> to vector<8x32xf32>
    %15 = arith.addf %12, %14 : vector<8x32xf32>
    %c0_5 = arith.constant 0 : index
    %c0_6 = arith.constant 0 : index
    %16 = vector.load %arg4[%c0_5, %c0_6] : memref<32x10xf32, #tpu.memory_space<vmem>>, vector<32x10xf32>
    %cst = arith.constant dense<0.000000e+00> : vector<8x10xf32>
    %17 = tpu.matmul %15, %16, %cst {dimension_numbers = #tpu.dot_dimension_numbers<[1], [0], [0], [1], [0, 0, 1, 1], [], []>} : vector<8x32xf32>, vector<32x10xf32>, vector<8x10xf32> -> vector<8x10xf32>
    %c0_7 = arith.constant 0 : index
    %c0_8 = arith.constant 0 : index
    %18 = vector.load %arg5[%c0_7, %c0_8] : memref<1x10xf32, #tpu.memory_space<vmem>>, vector<1x10xf32>
    %19 = vector.broadcast %18 : vector<1x10xf32> to vector<8x10xf32>
    %20 = arith.addf %17, %19 : vector<8x10xf32>
    %cst_9 = arith.constant dense<0xFF800000> : vector<8xf32>
    %21 = vector.multi_reduction <maximumf>, %20, %cst_9 [1] : vector<8x10xf32> to vector<8xf32>
    %22 = vector.shape_cast %21 : vector<8xf32> to vector<8x1xf32>
    %23 = vector.broadcast %22 : vector<8x1xf32> to vector<8x10xf32>
    %24 = arith.subf %20, %23 : vector<8x10xf32>
    %25 = math.exp %24 : vector<8x10xf32>
    %cst_10 = arith.constant dense<0.000000e+00> : vector<8xf32>
    %26 = vector.multi_reduction <add>, %25, %cst_10 [1] : vector<8x10xf32> to vector<8xf32>
    %27 = vector.shape_cast %26 : vector<8xf32> to vector<8x1xf32>
    %28 = vector.broadcast %27 : vector<8x1xf32> to vector<8x10xf32>
    %29 = arith.divf %25, %28 : vector<8x10xf32>
    %c0_11 = arith.constant 0 : index
    %c0_12 = arith.constant 0 : index
    %30 = vector.load %arg6[%c0_11, %c0_12] : memref<8x10xf32, #tpu.memory_space<vmem>>, vector<8x10xf32>
    tpu.vector_store %arg6[%c0_11, %c0_12], %29 {strides = array<i32>} : memref<8x10xf32, #tpu.memory_space<vmem>>, vector<8x10xf32>,
    return
  }
  func.func @transform_0(%arg0: i32) -> (i32, i32) {
    %c0_i32 = arith.constant 0 : i32
    %c0_i32_0 = arith.constant 0 : i32
    return %arg0, %c0_i32 : i32, i32
  }
  func.func @transform_1(%arg0: i32) -> (i32, i32) {
    %c0_i32 = arith.constant 0 : i32
    %c0_i32_0 = arith.constant 0 : i32
    %c0_i32_1 = arith.constant 0 : i32
    return %c0_i32, %c0_i32_0 : i32, i32
  }
  func.func @transform_2(%arg0: i32) -> (i32, i32) {
    %c0_i32 = arith.constant 0 : i32
    %c0_i32_0 = arith.constant 0 : i32
    %c0_i32_1 = arith.constant 0 : i32
    return %c0_i32, %c0_i32_0 : i32, i32
  }
  func.func @transform_3(%arg0: i32) -> (i32, i32) {
    %c0_i32 = arith.constant 0 : i32
    %c0_i32_0 = arith.constant 0 : i32
    %c0_i32_1 = arith.constant 0 : i32
    return %c0_i32, %c0_i32_0 : i32, i32
  }
  func.func @transform_4(%arg0: i32) -> (i32, i32) {
    %c0_i32 = arith.constant 0 : i32
    %c0_i32_0 = arith.constant 0 : i32
    %c0_i32_1 = arith.constant 0 : i32
    return %c0_i32, %c0_i32_0 : i32, i32
  }
  func.func @transform_5(%arg0: i32) -> (i32, i32) {
    %c0_i32 = arith.constant 0 : i32
    %c0_i32_0 = arith.constant 0 : i32
    return %arg0, %c0_i32 : i32, i32
  }
}

</mosaic_0001>

<bundles_post_ra>
// kernel: tpu_custom_call.1
= control target key start
LH: loop header
LB: loop body
LE: loop exit
PB: predicated region body
PF: predicated region fallthrough
CT: control target
= control target key end

     0   :  { %v215_v1 = vmov 0   ;;  %v216_v2 = vmov 0.0   ;;  %s280_s0 = inlined_call_operand.vmem [shape: f32[8,2], index: 0, kind: input, shape index: {}]   ;;  %s281_s1 = inlined_call_operand.vmem [shape: f32[2,32], index: 1, kind: input, shape index: {}]   ;;  %s282_s2 = inlined_call_operand.vmem [shape: f32[1,32], index: 2, kind: input, shape index: {}]   ;;  %s283_s3 = inlined_call_operand.vmem [shape: f32[32,10], index: 3, kind: input, shape index: {}]   ;;  %s284_s4 = inlined_call_operand.vmem [shape: f32[1,10], index: 4, kind: input, shape index: {}]   ;;  %s285_s5 = inlined_call_operand.hbm [shape: f32[8,10], index: 5, kind: output, shape index: {}]  }
   0x1   :  { %v21_v0 = vld [vmem:[%s280_s0] sm:$0xff]  ;;  %187 = vset.pattern.permute.xlu0 %v215_v1  ;;  %171 = vmatprep.subr.mxu0 %v216_v2  ;;  %v54_v3 = vld [vmem:[%s283_s3 + $0x18] sm:$0xff] }
   0x2   :  { %10 = vsyncpa [#allocation3], 0  ;;  %25 = vperm.xlu0 %187, %v21_v0   ;;  %172 = vmatpush3.msra.mxu0 %v54_v3  ;;  %v53_v4 = vld [vmem:[%s283_s3 + $0x10] sm:$0xff]  ;;  %v52_v5 = vld [vmem:[%s283_s3 + $0x8] sm:$0xff]  ;;  %v217_v6 = vmov 1   ;;  %vm218_vm0 = vmmov 0   ;;  %v28_v8 = vlaneseq }
   0x3   :  { %173 = vmatprep.subr.mxu0 %v216_v2  ;;  %v51_v7 = vld [vmem:[%s283_s3] sm:$0xff]  ;;  %179 = vmatprep.mubr.msk.f32.mxu0 %vm218_vm0, %v216_v2  ;;  %vm62_vm1 = vcmask 261120   ;;  %vm136_vm2 = vcmask 80896  }
   0x4   :  { %174 = vmatpush3.msra.mxu0 %v53_v4  ;;  %v29_v9 = vshrl.u32 %v28_v8, 7  ;;  %v22_v12 = vld [vmem:[%s281_s1] sm:$0x3]  ;;  %s219_s1 = smov [#allocation2]  }
   0x5   :  { %175 = vmatprep.subr.mxu0 %v216_v2  ;;  %v163_v19 = vld [vmem:[%s282_s2] ss:$0 sm:$0xff]  ;;  %s155_s2 = sshll.u32 %s219_s1, 4  ;;  %s156_s2 = int_to_ptr.vmem [resolvable:$true] %s155_s2 }
   0x6   :  { %188 = vset.pattern.permute.xlu0 %v217_v6  ;;  %176 = vmatpush3.msra.mxu0 %v52_v5  ;;  %v30_v10 = vsub.s32 0, %v29_v9  ;;  %v39_v11 = vsub.s32 1, %v29_v9  ;;  %v164_v22 = vld [vmem:[%s284_s4] ss:$0 sm:$0xff]  ;;  %s193_s4 = scalar_lea.vmem %s156_s2, 128  ;;  %p198_p1 = scmp.lt.s32.totalorder %s156_s2, %s156_s2 }
   0x7   :  { %34 = vperm.xlu0 %188, %v21_v0   ;;  %177 = vmatprep.subr.mxu0 %v216_v2  ;;  %p194_p0 = scmp.ne.s32.totalorder %s156_s2, %s193_s4  ;;  %p199_p2 = scmp.lt.s32.totalorder %s193_s4, %s193_s4 }
   0x8   :  { %178 = vmatpush3.msra.mxu0 %v51_v7  ;;  %v31_v14 = vrot.slane %v22_v12, %v30_v10  ;;  %v40_v15 = vrot.slane %v22_v12, %v39_v11 }
   0x9   :  { %p200_p3 = por %p199_p2, %p198_p1 }
   0xb   :  { %p201_p4 = pnand %p200_p3, %p194_p0 }
  0x7d   :  { %v26_v13 = vpop.permute.xlu0 %25 }
  0x7e   :  { %v32_v17 = vmul.f32 %v31_v14, %v26_v13 }
  0x82   :  { %v35_v16 = vpop.permute.xlu0 %34 }
  0x83   :  { %v41_v18 = vmul.f32 %v40_v15, %v35_v16 }
  0x85   :  { %v42_v20 = vadd.f32 %v41_v18, %v32_v17 }
  0x87   :  { %v50_v21 = vadd.f32 %v163_v19, %v42_v20 }
  0x89   :  { %180 = vmatmul.mubr.msk.f32.vlgmr.msra.gmra.mxu0 %vm62_vm1, %v50_v21 }
 0x149   :  { %v132_v23 = vpop.f32.mrf.mxu0 }
 0x14a   :  { %v133_v24 = vadd.f32 %v164_v22, %v132_v23 }
 0x14b   :  { %v181_v25 = vpop.f32.mrf.mxu0 }
 0x14c   :  { %v137_v26 = vsel %vm136_vm2, %v133_v24, -inf }
 0x14d   :  { %138 = vmax.xlane.f32.xlu1 %v137_v26 }
 0x1d6   :  { %v139_v27 = vpop.xlane.xlu1 %138 }
 0x1d7   :  { %v140_v28 = vsub.f32 %v133_v24, %v139_v27 }
 0x1d9   :  { %v141_v29 = vmul.f32 1.442695, %v140_v28 }
 0x1db   :  { %189 = vpow2.f32 %v141_v29 }
 0x1e8   :  { %v190_v30 = vpop.eup %189 }
 0x1e9   :  { %v143_v31 = vsel %vm136_vm2, %v190_v30, 0.0 }
 0x1ea   :  { %144 = vadd.xlane.f32.xlu1 %v143_v31 }
 0x273   :  { %v145_v32 = vpop.xlane.xlu1 %144 }
 0x274   :  { %191 = vrcp.f32 %v145_v32 }
 0x281   :  { %v192_v33 = vpop.eup %191 }
 0x282   :  { %v147_v34 = vmul.f32 %v192_v33, %v190_v30 }
 0x284   :  { %148 = vst.msk [vmem:[#allocation2] sm:$0xff] %vm136_vm2, %v147_v34 }
 0x285   :  { %204 = shalt.err (!%p201_p4)
}
 0x286   :  { %158 = dma.vmem_to_hbm [thread:$0]  %s156_s2, 128, %s285_s5, [#allocation3]  }
 0x287   :  { %213 = dma.done.wait [#allocation3], 128  }
 0x288   :  { %214 = vsyncadd [#allocation3], 4294967168 }
 0x289   :  { %162 = vsyncpa [#allocation3], 1 }

</bundles_post_ra>
